<compile_context>
chip_gen: v7x
topology: tpu7x:2x2x1
jax: 0.10.0
libtpu: 0.0.40
codegen_flags: <defaults>
</compile_context>

<pallas_src>
import functools

import jax
import jax.numpy as jnp
import numpy as np
from jax.experimental import pallas as pl
from jax.experimental.pallas import tpu as pltpu

_LOSS_LANES = 128          # lane-dense packed loss row
_REC_DTYPE = jnp.bfloat16  # rec activations are exactly {0,1}: bf16 is lossless


def _round_up(n, m):
    return ((n + m - 1) // m) * m


def _vmem_bytes_estimate(tb, layers):
    """Rough per-call VMEM footprint (double-buffered tiles + resident weights)."""
    dims = list(layers)
    num_layers = len(dims) - 1
    w_bytes = 0
    for i in range(num_layers):
        w_bytes += dims[i] * dims[i + 1] * 4 + dims[i + 1] * 4   # recognition_i
        w_bytes += dims[i + 1] * dims[i] * 4 + dims[i] * 4       # generation mirror
    w_bytes += dims[-1] * 4                                      # g_bias
    x_tile = tb * dims[0] * 4
    rec_tiles = tb * sum(dims[1:]) * 2                           # bf16 outputs
    loss_tile = 8 * _LOSS_LANES * 4
    return 2 * (x_tile + rec_tiles + loss_tile) + 2 * w_bytes


# ----------------------------------------------------------------------------
# Fused wake-pass kernel (one grid step = one TB-row batch tile)
# ----------------------------------------------------------------------------
def _make_wake_kernel(num_layers, b_real, b_pad, tb, use_bf16):
    """Ref order:
      inputs : x, (Wr_0, br_0, ..., Wr_{L-1}, br_{L-1}), g_bias,
               (Wg_0, bg_0, ..., Wg_{L-1}, bg_{L-1})      [all unpadded, f32]
      outputs: rec_0..rec_{L-1} (bf16, (TB, d) tiles),
               loss partial sums (1, 8, 128) per tile.
    """
    n_in = 2 + 4 * num_layers
    mm_dtype = jnp.bfloat16 if use_bf16 else jnp.float32
    needs_mask = b_pad > b_real  # only then do padded rows exist

    def kernel(*refs):
        x_ref = refs[0]
        r_refs = refs[1:1 + 2 * num_layers]
        gb_ref = refs[1 + 2 * num_layers]
        g_refs = refs[2 + 2 * num_layers:2 + 4 * num_layers]
        rec_refs = refs[n_in:n_in + num_layers]
        loss_ref = refs[n_in + num_layers]

        tile = pl.program_id(0)

        # Row-validity mask for this tile, built ONCE and reused by all losses.
        if needs_mask:
            row_ids = (jax.lax.broadcasted_iota(jnp.int32, (tb, 1), 0)
                       + tile * tb)
            row_mask = row_ids < b_real                               # (tb, 1)
            row_mask_f = row_mask.astype(jnp.float32)
            n_valid = jnp.sum(row_mask_f, axis=0, keepdims=True)      # (1, 1)
        else:
            row_mask = None
            row_mask_f = None
            n_valid = jnp.full((1, 1), float(tb), jnp.float32)

        def linear(a, w_ref, b_ref):
            # bf16 operands on the MXU fast path; f32 accumulate; f32 bias add.
            z = jnp.dot(a.astype(mm_dtype), w_ref[...].astype(mm_dtype),
                        preferred_element_type=jnp.float32)
            return z + b_ref[...]

        def softplus(z):
            return jnp.maximum(z, 0.0) + jnp.log(1.0 + jnp.exp(-jnp.abs(z)))

        def masked_sum(per_elem):
            if needs_mask:
                per_elem = jnp.where(row_mask, per_elem, 0.0)
            return jnp.sum(per_elem, axis=(0, 1), keepdims=True)      # (1, 1)

        # ---- recognition chain (activations written straight to outputs) ---
        h = x_ref[...]
        for i in range(num_layers):
            z = linear(h, r_refs[2 * i], r_refs[2 * i + 1])
            # round(sigmoid(z)) == 1 iff z > 0 (z == 0 -> 0, matches
            # round-half-to-even on 0.5).
            h = jnp.where(z > 0.0, 1.0, 0.0)
            rec_refs[i][...] = h.astype(_REC_DTYPE)

        # ---- g_bias BCE, de-broadcast: softplus once per column ------------
        zb = gb_ref[...]                                   # (1, d_last) logits
        sp_pos_b = softplus(zb)
        sp_neg_b = sp_pos_b - zb
        t_last = rec_refs[num_layers - 1][...].astype(jnp.float32)
        if needs_mask:
            t_last = t_last * row_mask_f
        cnt1 = jnp.sum(t_last, axis=0, keepdims=True)      # (1, d_last)
        cnt0 = n_valid - cnt1
        bias_sum = jnp.sum(cnt1 * jnp.minimum(sp_neg_b, 100.0)
                           + cnt0 * jnp.minimum(sp_pos_b, 100.0),
                           axis=1, keepdims=True)          # (1, 1)
        losses = [bias_sum]

        # ---- generation losses (inputs read back from the VMEM outputs) ----
        for i in range(num_layers):
            x_in = rec_refs[num_layers - 1 - i][...]
            z = linear(x_in, g_refs[2 * i], g_refs[2 * i + 1])
            sp_pos = softplus(z)
            if i == num_layers - 1:
                # Target is the raw input x (not guaranteed binary):
                # use the general clamped form (same as nn.BCELoss).
                t = x_ref[...]
                sp_neg = sp_pos - z
                per = (t * jnp.minimum(sp_neg, 100.0)
                       + (1.0 - t) * jnp.minimum(sp_pos, 100.0))
            else:
                # Target is a binarized activation (exactly 0/1): cheap form.
                t = rec_refs[num_layers - 2 - i][...].astype(jnp.float32)
                per = jnp.minimum(sp_pos - t * z, 100.0)
            losses.append(masked_sum(per))

        # ---- pack partial loss sums into one lane-dense (1, 8, 128) tile ---
        lane = jax.lax.broadcasted_iota(jnp.int32, (1, _LOSS_LANES), 1)
        row = jnp.zeros((1, _LOSS_LANES), jnp.float32)
        for k, lv in enumerate(losses):
            row = jnp.where(lane == k, lv, row)
        loss_ref[...] = jnp.broadcast_to(row[:, None, :], (1, 8, _LOSS_LANES))

    return kernel


# ----------------------------------------------------------------------------
# Wrapper: batch grid, unpadded weights, per-tile partial losses reduced here
# ----------------------------------------------------------------------------
@functools.partial(jax.jit,
                   static_argnames=("layers", "use_bf16_matmul", "batch_tile"))
def helmholtz_wake_forward(params, x, layers, use_bf16_matmul=True,
                           batch_tile=None):
    layers = tuple(int(d) for d in layers)
    num_layers = len(layers) - 1
    assert num_layers >= 2, "need at least 3 layer sizes"
    assert num_layers + 1 <= _LOSS_LANES

    B = int(x.shape[0])

    # Pick the batch tile: 16-row aligned (bf16 output tiling), sized so the
    # double-buffered tiles + resident weights fit a v7x-safe VMEM budget.
    if batch_tile is None:
        tb = min(256, _round_up(B, 16))
        budget = 40 * 1024 * 1024
        while tb > 16 and _vmem_bytes_estimate(tb, layers) > budget:
            tb //= 2
        tb = max(16, tb)
    else:
        tb = int(batch_tile)
        assert tb % 8 == 0 and tb > 0
    b_pad = _round_up(B, tb)
    num_tiles = b_pad // tb

    # Only the batch dim of x ever gets (zero) padding; weights go in as-is.
    x_in = x.astype(jnp.float32)
    if b_pad > B:
        x_in = jnp.pad(x_in, ((0, b_pad - B), (0, 0)))

    inputs = [x_in]
    in_specs = [pl.BlockSpec((tb, layers[0]), lambda ti: (ti, 0))]

    for i in range(num_layers):
        w_t, b = params["r"][i]
        w_t = w_t.astype(jnp.float32)
        b = b.astype(jnp.float32).reshape(1, -1)
        inputs += [w_t, b]
        in_specs += [pl.BlockSpec(w_t.shape, lambda ti: (0, 0)),
                     pl.BlockSpec(b.shape, lambda ti: (0, 0))]

    gb = params["g_bias"].astype(jnp.float32).reshape(1, -1)
    inputs.append(gb)
    in_specs.append(pl.BlockSpec(gb.shape, lambda ti: (0, 0)))

    for i in range(num_layers):
        w_t, b = params["g"][i]
        w_t = w_t.astype(jnp.float32)
        b = b.astype(jnp.float32).reshape(1, -1)
        inputs += [w_t, b]
        in_specs += [pl.BlockSpec(w_t.shape, lambda ti: (0, 0)),
                     pl.BlockSpec(b.shape, lambda ti: (0, 0))]

    out_shape = tuple(
        [jax.ShapeDtypeStruct((b_pad, layers[i + 1]), _REC_DTYPE)
         for i in range(num_layers)]
        + [jax.ShapeDtypeStruct((num_tiles, 8, _LOSS_LANES), jnp.float32)])
    out_specs = tuple(
        [pl.BlockSpec((tb, layers[i + 1]), lambda ti: (ti, 0))
         for i in range(num_layers)]
        + [pl.BlockSpec((1, 8, _LOSS_LANES), lambda ti: (ti, 0, 0))])

    # Cost estimate (helps XLA schedule neighbors around the fused call).
    mm_elems = sum(layers[i] * layers[i + 1] for i in range(num_layers))
    flops = int(4 * b_pad * mm_elems)                       # rec + gen matmuls
    transcendentals = int(b_pad * sum(layers[:num_layers]) + layers[-1])
    bytes_accessed = int(
        sum(int(np.prod(a.shape)) * a.dtype.itemsize for a in inputs)
        + b_pad * sum(layers[1:]) * 2
        + num_tiles * 8 * _LOSS_LANES * 4)

    vmem_need = _vmem_bytes_estimate(tb, layers)
    vmem_limit = int(min(max(2 * vmem_need + (4 << 20), 16 << 20), 48 << 20))

    kernel = _make_wake_kernel(num_layers, B, b_pad, tb, use_bf16_matmul)

    outs = pl.pallas_call(
        kernel,
        grid=(num_tiles,),
        in_specs=in_specs,
        out_specs=out_specs,
        out_shape=out_shape,
        compiler_params=pltpu.CompilerParams(
            dimension_semantics=("parallel",),
            vmem_limit_bytes=vmem_limit),
        cost_estimate=pl.CostEstimate(flops=flops,
                                      transcendentals=transcendentals,
                                      bytes_accessed=bytes_accessed),
    )(*inputs)

    rec_padded = outs[:num_layers]
    loss_part = outs[num_layers]                       # (num_tiles, 8, 128)
    totals = jnp.sum(loss_part[:, 0, :], axis=0)       # (128,) total sums

    recognition_outputs = [rec_padded[i][:B, :].astype(jnp.float32)
                           for i in range(num_layers)]
    generation_bias_loss = totals[0] / float(B * layers[-1])
    generation_loss = [totals[1 + i] / float(B * layers[num_layers - 1 - i])
                       for i in range(num_layers)]
    return recognition_outputs, generation_bias_loss, generation_loss


# ----------------------------------------------------------------------------
# Parameter init (matches PyTorch shapes / init ranges; weights transposed)
# ----------------------------------------------------------------------------
def init_params(key, layers):
    num_layers = len(layers) - 1
    params = {"r": [], "g": []}
    for i in range(num_layers):
        fin, fout = layers[i], layers[i + 1]
        key, kw, kb = jax.random.split(key, 3)
        bound = 1.0 / np.sqrt(fin)
        w_t = jax.random.uniform(kw, (fin, fout), jnp.float32, -bound, bound)
        b = jax.random.uniform(kb, (1, fout), jnp.float32, -bound, bound)
        params["r"].append((w_t, b))
    for i in list(range(num_layers))[::-1]:
        fin, fout = layers[i + 1], layers[i]
        key, kw, kb = jax.random.split(key, 3)
        bound = 1.0 / np.sqrt(fin)
        w_t = jax.random.uniform(kw, (fin, fout), jnp.float32, -bound, bound)
        b = jax.random.uniform(kb, (1, fout), jnp.float32, -bound, bound)
        params["g"].append((w_t, b))
    key, kgb = jax.random.split(key)
    params["g_bias"] = jax.random.uniform(kgb, (1, layers[-1]), jnp.float32,
                                          -1.0, 1.0)
    return params


# ----------------------------------------------------------------------------
# Pure-JAX reference (PyTorch semantics: sigmoid -> log with -100 clamp)
# ----------------------------------------------------------------------------
def _bce_ref(p, t):
    lp = jnp.maximum(jnp.log(p), -100.0)
    lq = jnp.maximum(jnp.log(1.0 - p), -100.0)
    return jnp.mean(-(t * lp + (1.0 - t) * lq))


def reference_forward(params, x, num_layers):
    rec = []
    h = x
    for i in range(num_layers):
        w_t, b = params["r"][i]
        h = jnp.round(jax.nn.sigmoid(h @ w_t + b))
        rec.append(h)
    bias_loss = _bce_ref(
        jnp.broadcast_to(jax.nn.sigmoid(params["g_bias"]), rec[-1].shape),
        rec[-1])
    gen_losses = []
    for i in range(num_layers):
        xin = rec[-(i + 1)]
        xt = x if i == num_layers - 1 else rec[-(i + 2)]
        w_t, b = params["g"][i]
        gen_losses.append(_bce_ref(jax.nn.sigmoid(xin @ w_t + b), xt))
    return rec, bias_loss, gen_losses


# ----------------------------------------------------------------------------
if __name__ == "__main__":
    layers = (64, 32, 16)          # small version of the default [784, 128, 32]
    num_layers = len(layers) - 1
    batch = 20                     # not a tile multiple -> exercises masking

    key = jax.random.PRNGKey(0)
    kp, kx = jax.random.split(key)
    params = init_params(kp, list(layers))
    # Binary input in [0,1] (BCE target must lie in [0,1]).
    x = jax.random.bernoulli(kx, 0.5, (batch, layers[0])).astype(jnp.float32)

    # 1) f32 MXU path with a forced 16-row tile (2 grid tiles, last one padded)
    #    -> strict parity against the pure-JAX / PyTorch-semantics reference.
    rec_outs, bias_loss, gen_losses = helmholtz_wake_forward(
        params, x, layers, use_bf16_matmul=False, batch_tile=16)
    jax.block_until_ready(bias_loss)

    rec_ref, bias_ref, gen_ref = reference_forward(params, x, num_layers)
    for a, b in zip(rec_outs, rec_ref):
        np.testing.assert_allclose(np.asarray(a), np.asarray(b), atol=1e-5)
    np.testing.assert_allclose(np.asarray(bias_loss), np.asarray(bias_ref),
                               rtol=2e-5, atol=1e-6)
    for a, b in zip(gen_losses, gen_ref):
        np.testing.assert_allclose(np.asarray(a), np.asarray(b),
                                   rtol=2e-5, atol=1e-6)

    # 2) default fast path (bf16 MXU operands, auto batch tile): run + sanity.
    #    (bf16 weight rounding may legitimately flip near-zero binarizations,
    #     so no bit-exact comparison here.)
    rec_b, bias_b, gen_b = helmholtz_wake_forward(params, x, layers)
    jax.block_until_ready(bias_b)
    for i, r in enumerate(rec_b):
        v = np.asarray(r)
        assert v.shape == (batch, layers[i + 1])
        assert np.all((v == 0.0) | (v == 1.0))
    assert np.isfinite(np.asarray(bias_b))
    assert all(np.isfinite(np.asarray(g)) for g in gen_b)

    print("KERNEL_OK")
</pallas_src>

<mosaic_0001>
module attributes {stable_mosaic.version = 11 : i64} {
  func.func @kernel(%arg0: i32, %arg1: memref<16x64xf32, #tpu.memory_space<vmem>>, %arg2: memref<64x32xf32, #tpu.memory_space<vmem>>, %arg3: memref<1x32xf32, #tpu.memory_space<vmem>>, %arg4: memref<32x16xf32, #tpu.memory_space<vmem>>, %arg5: memref<1x16xf32, #tpu.memory_space<vmem>>, %arg6: memref<1x16xf32, #tpu.memory_space<vmem>>, %arg7: memref<16x32xf32, #tpu.memory_space<vmem>>, %arg8: memref<1x32xf32, #tpu.memory_space<vmem>>, %arg9: memref<32x64xf32, #tpu.memory_space<vmem>>, %arg10: memref<1x64xf32, #tpu.memory_space<vmem>>, %arg11: memref<16x32xbf16, #tpu.memory_space<vmem>>, %arg12: memref<16x16xbf16, #tpu.memory_space<vmem>>, %arg13: memref<1x8x128xf32, #tpu.memory_space<vmem>>) attributes {dimension_semantics = [#tpu.dimension_semantics<parallel>], iteration_bounds = array<i64: 2>, scalar_prefetch = 0 : i64, scratch_operands = 0 : i64, tpu.core_type = #tpu.core_type<tc>, window_params = [{transform_indices = @transform_0, window_bounds = array<i64: 16, 64>}, {pipeline_mode = #tpu.pipeline_mode<synchronous>, transform_indices = @transform_1, window_bounds = array<i64: 64, 32>}, {pipeline_mode = #tpu.pipeline_mode<synchronous>, transform_indices = @transform_2, window_bounds = array<i64: 1, 32>}, {pipeline_mode = #tpu.pipeline_mode<synchronous>, transform_indices = @transform_3, window_bounds = array<i64: 32, 16>}, {pipeline_mode = #tpu.pipeline_mode<synchronous>, transform_indices = @transform_4, window_bounds = array<i64: 1, 16>}, {pipeline_mode = #tpu.pipeline_mode<synchronous>, transform_indices = @transform_5, window_bounds = array<i64: 1, 16>}, {pipeline_mode = #tpu.pipeline_mode<synchronous>, transform_indices = @transform_6, window_bounds = array<i64: 16, 32>}, {pipeline_mode = #tpu.pipeline_mode<synchronous>, transform_indices = @transform_7, window_bounds = array<i64: 1, 32>}, {pipeline_mode = #tpu.pipeline_mode<synchronous>, transform_indices = @transform_8, window_bounds = array<i64: 32, 64>}, {pipeline_mode = #tpu.pipeline_mode<synchronous>, transform_indices = @transform_9, window_bounds = array<i64: 1, 64>}, {transform_indices = @transform_10, window_bounds = array<i64: 16, 32>}, {transform_indices = @transform_11, window_bounds = array<i64: 16, 16>}, {transform_indices = @transform_12, window_bounds = array<i64: 1, 8, 128>}]} {
    %0 = tpu.iota {dimensions = array<i32: 0>} : vector<16x1xi32>
    %c16_i32 = arith.constant 16 : i32
    %1 = arith.muli %arg0, %c16_i32 : i32
    %2 = vector.broadcast %1 : i32 to vector<16x1xi32>
    %3 = arith.addi %0, %2 : vector<16x1xi32>
    %c20_i32 = arith.constant 20 : i32
    %4 = vector.broadcast %c20_i32 : i32 to vector<16x1xi32>
    %5 = arith.cmpi slt, %3, %4 : vector<16x1xi32>
    %6 = arith.extui %5 : vector<16x1xi1> to vector<16x1xi32>
    %7 = arith.sitofp %6 : vector<16x1xi32> to vector<16x1xf32>
    %cst = arith.constant dense<0.000000e+00> : vector<1xf32>
    %8 = vector.multi_reduction <add>, %7, %cst [0] : vector<16x1xf32> to vector<1xf32>
    %9 = vector.shape_cast %8 : vector<1xf32> to vector<1x1xf32>
    %c0 = arith.constant 0 : index
    %c0_0 = arith.constant 0 : index
    %10 = vector.load %arg1[%c0, %c0_0] : memref<16x64xf32, #tpu.memory_space<vmem>>, vector<16x64xf32>
    %c0_1 = arith.constant 0 : index
    %c0_2 = arith.constant 0 : index
    %11 = vector.load %arg2[%c0_1, %c0_2] : memref<64x32xf32, #tpu.memory_space<vmem>>, vector<64x32xf32>
    %cst_3 = arith.constant dense<0.000000e+00> : vector<16x32xf32>
    %12 = tpu.matmul %10, %11, %cst_3 {dimension_numbers = #tpu.dot_dimension_numbers<[1], [0], [0], [1], [0, 0, 1, 1], [], []>} : vector<16x64xf32>, vector<64x32xf32>, vector<16x32xf32> -> vector<16x32xf32>
    %c0_4 = arith.constant 0 : index
    %c0_5 = arith.constant 0 : index
    %13 = vector.load %arg3[%c0_4, %c0_5] : memref<1x32xf32, #tpu.memory_space<vmem>>, vector<1x32xf32>
    %14 = vector.broadcast %13 : vector<1x32xf32> to vector<16x32xf32>
    %15 = arith.addf %12, %14 : vector<16x32xf32>
    %cst_6 = arith.constant 0.000000e+00 : f32
    %16 = vector.broadcast %cst_6 : f32 to vector<16x32xf32>
    %17 = arith.cmpf ogt, %15, %16 : vector<16x32xf32>
    %cst_7 = arith.constant 1.000000e+00 : f32
    %cst_8 = arith.constant 0.000000e+00 : f32
    %18 = vector.broadcast %cst_7 : f32 to vector<16x32xf32>
    %19 = vector.broadcast %cst_8 : f32 to vector<16x32xf32>
    %20 = arith.select %17, %18, %19 : vector<16x32xi1>, vector<16x32xf32>
    %21 = arith.truncf %20 : vector<16x32xf32> to vector<16x32xbf16>
    %c0_9 = arith.constant 0 : index
    %c0_10 = arith.constant 0 : index
    %22 = vector.load %arg11[%c0_9, %c0_10] : memref<16x32xbf16, #tpu.memory_space<vmem>>, vector<16x32xbf16>
    tpu.vector_store %arg11[%c0_9, %c0_10], %21 {strides = array<i32>} : memref<16x32xbf16, #tpu.memory_space<vmem>>, vector<16x32xbf16>,
    %c0_11 = arith.constant 0 : index
    %c0_12 = arith.constant 0 : index
    %23 = vector.load %arg4[%c0_11, %c0_12] : memref<32x16xf32, #tpu.memory_space<vmem>>, vector<32x16xf32>
    %cst_13 = arith.constant dense<0.000000e+00> : vector<16x16xf32>
    %24 = tpu.matmul %20, %23, %cst_13 {dimension_numbers = #tpu.dot_dimension_numbers<[1], [0], [0], [1], [0, 0, 1, 1], [], []>} : vector<16x32xf32>, vector<32x16xf32>, vector<16x16xf32> -> vector<16x16xf32>
    %c0_14 = arith.constant 0 : index
    %c0_15 = arith.constant 0 : index
    %25 = vector.load %arg5[%c0_14, %c0_15] : memref<1x16xf32, #tpu.memory_space<vmem>>, vector<1x16xf32>
    %26 = vector.broadcast %25 : vector<1x16xf32> to vector<16x16xf32>
    %27 = arith.addf %24, %26 : vector<16x16xf32>
    %cst_16 = arith.constant 0.000000e+00 : f32
    %28 = vector.broadcast %cst_16 : f32 to vector<16x16xf32>
    %29 = arith.cmpf ogt, %27, %28 : vector<16x16xf32>
    %cst_17 = arith.constant 1.000000e+00 : f32
    %cst_18 = arith.constant 0.000000e+00 : f32
    %30 = vector.broadcast %cst_17 : f32 to vector<16x16xf32>
    %31 = vector.broadcast %cst_18 : f32 to vector<16x16xf32>
    %32 = arith.select %29, %30, %31 : vector<16x16xi1>, vector<16x16xf32>
    %33 = arith.truncf %32 : vector<16x16xf32> to vector<16x16xbf16>
    %c0_19 = arith.constant 0 : index
    %c0_20 = arith.constant 0 : index
    %34 = vector.load %arg12[%c0_19, %c0_20] : memref<16x16xbf16, #tpu.memory_space<vmem>>, vector<16x16xbf16>
    tpu.vector_store %arg12[%c0_19, %c0_20], %33 {strides = array<i32>} : memref<16x16xbf16, #tpu.memory_space<vmem>>, vector<16x16xbf16>,
    %c0_21 = arith.constant 0 : index
    %c0_22 = arith.constant 0 : index
    %35 = vector.load %arg6[%c0_21, %c0_22] : memref<1x16xf32, #tpu.memory_space<vmem>>, vector<1x16xf32>
    %cst_23 = arith.constant 0.000000e+00 : f32
    %36 = vector.broadcast %cst_23 : f32 to vector<1x16xf32>
    %37 = arith.maximumf %35, %36 : vector<1x16xf32>
    %38 = math.absf %35 : vector<1x16xf32>
    %cst_24 = arith.constant 0.000000e+00 : f32
    %39 = vector.broadcast %cst_24 : f32 to vector<1x16xf32>
    %40 = arith.subf %39, %38 : vector<1x16xf32>
    %41 = math.exp %40 : vector<1x16xf32>
    %cst_25 = arith.constant 1.000000e+00 : f32
    %42 = vector.broadcast %cst_25 : f32 to vector<1x16xf32>
    %43 = arith.addf %42, %41 : vector<1x16xf32>
    %44 = math.log %43 : vector<1x16xf32>
    %45 = arith.addf %37, %44 : vector<1x16xf32>
    %46 = arith.subf %45, %35 : vector<1x16xf32>
    %c0_26 = arith.constant 0 : index
    %c0_27 = arith.constant 0 : index
    %47 = vector.load %arg12[%c0_26, %c0_27] : memref<16x16xbf16, #tpu.memory_space<vmem>>, vector<16x16xbf16>
    %48 = arith.extf %47 : vector<16x16xbf16> to vector<16x16xf32>
    %49 = vector.broadcast %7 : vector<16x1xf32> to vector<16x16xf32>
    %50 = arith.mulf %48, %49 : vector<16x16xf32>
    %cst_28 = arith.constant dense<0.000000e+00> : vector<16xf32>
    %51 = vector.multi_reduction <add>, %50, %cst_28 [0] : vector<16x16xf32> to vector<16xf32>
    %52 = vector.shape_cast %51 : vector<16xf32> to vector<1x16xf32>
    %53 = vector.broadcast %9 : vector<1x1xf32> to vector<1x16xf32>
    %54 = arith.subf %53, %52 : vector<1x16xf32>
    %cst_29 = arith.constant 1.000000e+02 : f32
    %55 = vector.broadcast %cst_29 : f32 to vector<1x16xf32>
    %56 = arith.minimumf %46, %55 : vector<1x16xf32>
    %57 = arith.mulf %52, %56 : vector<1x16xf32>
    %cst_30 = arith.constant 1.000000e+02 : f32
    %58 = vector.broadcast %cst_30 : f32 to vector<1x16xf32>
    %59 = arith.minimumf %45, %58 : vector<1x16xf32>
    %60 = arith.mulf %54, %59 : vector<1x16xf32>
    %61 = arith.addf %57, %60 : vector<1x16xf32>
    %cst_31 = arith.constant dense<0.000000e+00> : vector<1xf32>
    %62 = vector.multi_reduction <add>, %61, %cst_31 [1] : vector<1x16xf32> to vector<1xf32>
    %63 = vector.shape_cast %62 : vector<1xf32> to vector<1x1xf32>
    %c0_32 = arith.constant 0 : index
    %c0_33 = arith.constant 0 : index
    %64 = vector.load %arg12[%c0_32, %c0_33] : memref<16x16xbf16, #tpu.memory_space<vmem>>, vector<16x16xbf16>
    %65 = arith.extf %64 : vector<16x16xbf16> to vector<16x16xf32>
    %c0_34 = arith.constant 0 : index
    %c0_35 = arith.constant 0 : index
    %66 = vector.load %arg7[%c0_34, %c0_35] : memref<16x32xf32, #tpu.memory_space<vmem>>, vector<16x32xf32>
    %cst_36 = arith.constant dense<0.000000e+00> : vector<16x32xf32>
    %67 = tpu.matmul %65, %66, %cst_36 {dimension_numbers = #tpu.dot_dimension_numbers<[1], [0], [0], [1], [0, 0, 1, 1], [], []>} : vector<16x16xf32>, vector<16x32xf32>, vector<16x32xf32> -> vector<16x32xf32>
    %c0_37 = arith.constant 0 : index
    %c0_38 = arith.constant 0 : index
    %68 = vector.load %arg8[%c0_37, %c0_38] : memref<1x32xf32, #tpu.memory_space<vmem>>, vector<1x32xf32>
    %69 = vector.broadcast %68 : vector<1x32xf32> to vector<16x32xf32>
    %70 = arith.addf %67, %69 : vector<16x32xf32>
    %cst_39 = arith.constant 0.000000e+00 : f32
    %71 = vector.broadcast %cst_39 : f32 to vector<16x32xf32>
    %72 = arith.maximumf %70, %71 : vector<16x32xf32>
    %73 = math.absf %70 : vector<16x32xf32>
    %cst_40 = arith.constant 0.000000e+00 : f32
    %74 = vector.broadcast %cst_40 : f32 to vector<16x32xf32>
    %75 = arith.subf %74, %73 : vector<16x32xf32>
    %76 = math.exp %75 : vector<16x32xf32>
    %cst_41 = arith.constant 1.000000e+00 : f32
    %77 = vector.broadcast %cst_41 : f32 to vector<16x32xf32>
    %78 = arith.addf %77, %76 : vector<16x32xf32>
    %79 = math.log %78 : vector<16x32xf32>
    %80 = arith.addf %72, %79 : vector<16x32xf32>
    %c0_42 = arith.constant 0 : index
    %c0_43 = arith.constant 0 : index
    %81 = vector.load %arg11[%c0_42, %c0_43] : memref<16x32xbf16, #tpu.memory_space<vmem>>, vector<16x32xbf16>
    %82 = arith.extf %81 : vector<16x32xbf16> to vector<16x32xf32>
    %83 = arith.mulf %82, %70 : vector<16x32xf32>
    %84 = arith.subf %80, %83 : vector<16x32xf32>
    %cst_44 = arith.constant 1.000000e+02 : f32
    %85 = vector.broadcast %cst_44 : f32 to vector<16x32xf32>
    %86 = arith.minimumf %84, %85 : vector<16x32xf32>
    %cst_45 = arith.constant 0.000000e+00 : f32
    %87 = vector.shape_cast %5 : vector<16x1xi1> to vector<16x1xi1>
    %88 = vector.broadcast %87 : vector<16x1xi1> to vector<16x32xi1>
    %89 = vector.broadcast %cst_45 : f32 to vector<16x32xf32>
    %90 = arith.select %88, %86, %89 : vector<16x32xi1>, vector<16x32xf32>
    %91 = vector.shape_cast %90 : vector<16x32xf32> to vector<1x16x32xf32>
    %cst_46 = arith.constant dense<0.000000e+00> : vector<1xf32>
    %92 = vector.multi_reduction <add>, %91, %cst_46 [1, 2] : vector<1x16x32xf32> to vector<1xf32>
    %93 = vector.shape_cast %92 : vector<1xf32> to vector<1x1x1xf32>
    %94 = vector.extract %93[0, 0, 0] : f32 from vector<1x1x1xf32>
    %95 = vector.broadcast %94 : f32 to vector<1x1xf32>
    %c0_47 = arith.constant 0 : index
    %c0_48 = arith.constant 0 : index
    %96 = vector.load %arg11[%c0_47, %c0_48] : memref<16x32xbf16, #tpu.memory_space<vmem>>, vector<16x32xbf16>
    %97 = arith.extf %96 : vector<16x32xbf16> to vector<16x32xf32>
    %c0_49 = arith.constant 0 : index
    %c0_50 = arith.constant 0 : index
    %98 = vector.load %arg9[%c0_49, %c0_50] : memref<32x64xf32, #tpu.memory_space<vmem>>, vector<32x64xf32>
    %cst_51 = arith.constant dense<0.000000e+00> : vector<16x64xf32>
    %99 = tpu.matmul %97, %98, %cst_51 {dimension_numbers = #tpu.dot_dimension_numbers<[1], [0], [0], [1], [0, 0, 1, 1], [], []>} : vector<16x32xf32>, vector<32x64xf32>, vector<16x64xf32> -> vector<16x64xf32>
    %c0_52 = arith.constant 0 : index
    %c0_53 = arith.constant 0 : index
    %100 = vector.load %arg10[%c0_52, %c0_53] : memref<1x64xf32, #tpu.memory_space<vmem>>, vector<1x64xf32>
    %101 = vector.broadcast %100 : vector<1x64xf32> to vector<16x64xf32>
    %102 = arith.addf %99, %101 : vector<16x64xf32>
    %cst_54 = arith.constant 0.000000e+00 : f32
    %103 = vector.broadcast %cst_54 : f32 to vector<16x64xf32>
    %104 = arith.maximumf %102, %103 : vector<16x64xf32>
    %105 = math.absf %102 : vector<16x64xf32>
    %cst_55 = arith.constant 0.000000e+00 : f32
    %106 = vector.broadcast %cst_55 : f32 to vector<16x64xf32>
    %107 = arith.subf %106, %105 : vector<16x64xf32>
    %108 = math.exp %107 : vector<16x64xf32>
    %cst_56 = arith.constant 1.000000e+00 : f32
    %109 = vector.broadcast %cst_56 : f32 to vector<16x64xf32>
    %110 = arith.addf %109, %108 : vector<16x64xf32>
    %111 = math.log %110 : vector<16x64xf32>
    %112 = arith.addf %104, %111 : vector<16x64xf32>
    %c0_57 = arith.constant 0 : index
    %c0_58 = arith.constant 0 : index
    %113 = vector.load %arg1[%c0_57, %c0_58] : memref<16x64xf32, #tpu.memory_space<vmem>>, vector<16x64xf32>
    %114 = arith.subf %112, %102 : vector<16x64xf32>
    %cst_59 = arith.constant 1.000000e+02 : f32
    %115 = vector.broadcast %cst_59 : f32 to vector<16x64xf32>
    %116 = arith.minimumf %114, %115 : vector<16x64xf32>
    %117 = arith.mulf %113, %116 : vector<16x64xf32>
    %cst_60 = arith.constant 1.000000e+00 : f32
    %118 = vector.broadcast %cst_60 : f32 to vector<16x64xf32>
    %119 = arith.subf %118, %113 : vector<16x64xf32>
    %cst_61 = arith.constant 1.000000e+02 : f32
    %120 = vector.broadcast %cst_61 : f32 to vector<16x64xf32>
    %121 = arith.minimumf %112, %120 : vector<16x64xf32>
    %122 = arith.mulf %119, %121 : vector<16x64xf32>
    %123 = arith.addf %117, %122 : vector<16x64xf32>
    %cst_62 = arith.constant 0.000000e+00 : f32
    %124 = vector.shape_cast %5 : vector<16x1xi1> to vector<16x1xi1>
    %125 = vector.broadcast %124 : vector<16x1xi1> to vector<16x64xi1>
    %126 = vector.broadcast %cst_62 : f32 to vector<16x64xf32>
    %127 = arith.select %125, %123, %126 : vector<16x64xi1>, vector<16x64xf32>
    %128 = vector.shape_cast %127 : vector<16x64xf32> to vector<1x16x64xf32>
    %cst_63 = arith.constant dense<0.000000e+00> : vector<1xf32>
    %129 = vector.multi_reduction <add>, %128, %cst_63 [1, 2] : vector<1x16x64xf32> to vector<1xf32>
    %130 = vector.shape_cast %129 : vector<1xf32> to vector<1x1x1xf32>
    %131 = vector.extract %130[0, 0, 0] : f32 from vector<1x1x1xf32>
    %132 = vector.broadcast %131 : f32 to vector<1x1xf32>
    %133 = tpu.iota {dimensions = array<i32: 1>} : vector<1x128xi32>
    %cst_64 = arith.constant 0.000000e+00 : f32
    %134 = vector.broadcast %cst_64 : f32 to vector<1x128xf32>
    %c0_i32 = arith.constant 0 : i32
    %135 = vector.broadcast %c0_i32 : i32 to vector<1x128xi32>
    %136 = arith.cmpi eq, %133, %135 : vector<1x128xi32>
    %137 = vector.shape_cast %63 : vector<1x1xf32> to vector<1x1xf32>
    %138 = vector.broadcast %137 : vector<1x1xf32> to vector<1x128xf32>
    %139 = arith.select %136, %138, %134 : vector<1x128xi1>, vector<1x128xf32>
    %c1_i32 = arith.constant 1 : i32
    %140 = vector.broadcast %c1_i32 : i32 to vector<1x128xi32>
    %141 = arith.cmpi eq, %133, %140 : vector<1x128xi32>
    %142 = vector.shape_cast %95 : vector<1x1xf32> to vector<1x1xf32>
    %143 = vector.broadcast %142 : vector<1x1xf32> to vector<1x128xf32>
    %144 = arith.select %141, %143, %139 : vector<1x128xi1>, vector<1x128xf32>
    %c2_i32 = arith.constant 2 : i32
    %145 = vector.broadcast %c2_i32 : i32 to vector<1x128xi32>
    %146 = arith.cmpi eq, %133, %145 : vector<1x128xi32>
    %147 = vector.shape_cast %132 : vector<1x1xf32> to vector<1x1xf32>
    %148 = vector.broadcast %147 : vector<1x1xf32> to vector<1x128xf32>
    %149 = arith.select %146, %148, %144 : vector<1x128xi1>, vector<1x128xf32>
    %150 = vector.shape_cast %149 : vector<1x128xf32> to vector<1x1x128xf32>
    %151 = vector.shape_cast %150 : vector<1x1x128xf32> to vector<1x1x128xf32>
    %152 = vector.broadcast %151 : vector<1x1x128xf32> to vector<1x8x128xf32>
    %c0_65 = arith.constant 0 : index
    %c0_66 = arith.constant 0 : index
    %c0_67 = arith.constant 0 : index
    %153 = vector.load %arg13[%c0_65, %c0_66, %c0_67] : memref<1x8x128xf32, #tpu.memory_space<vmem>>, vector<1x8x128xf32>
    tpu.vector_store %arg13[%c0_65, %c0_66, %c0_67], %152 {strides = array<i32>} : memref<1x8x128xf32, #tpu.memory_space<vmem>>, vector<1x8x128xf32>,
    return
  }
  func.func @transform_0(%arg0: i32) -> (i32, i32) {
    %c0_i32 = arith.constant 0 : i32
    %c0_i32_0 = arith.constant 0 : i32
    return %arg0, %c0_i32 : i32, i32
  }
  func.func @transform_1(%arg0: i32) -> (i32, i32) {
    %c0_i32 = arith.constant 0 : i32
    %c0_i32_0 = arith.constant 0 : i32
    %c0_i32_1 = arith.constant 0 : i32
    return %c0_i32, %c0_i32_0 : i32, i32
  }
  func.func @transform_2(%arg0: i32) -> (i32, i32) {
    %c0_i32 = arith.constant 0 : i32
    %c0_i32_0 = arith.constant 0 : i32
    %c0_i32_1 = arith.constant 0 : i32
    return %c0_i32, %c0_i32_0 : i32, i32
  }
  func.func @transform_3(%arg0: i32) -> (i32, i32) {
    %c0_i32 = arith.constant 0 : i32
    %c0_i32_0 = arith.constant 0 : i32
    %c0_i32_1 = arith.constant 0 : i32
    return %c0_i32, %c0_i32_0 : i32, i32
  }
  func.func @transform_4(%arg0: i32) -> (i32, i32) {
    %c0_i32 = arith.constant 0 : i32
    %c0_i32_0 = arith.constant 0 : i32
    %c0_i32_1 = arith.constant 0 : i32
    return %c0_i32, %c0_i32_0 : i32, i32
  }
  func.func @transform_5(%arg0: i32) -> (i32, i32) {
    %c0_i32 = arith.constant 0 : i32
    %c0_i32_0 = arith.constant 0 : i32
    %c0_i32_1 = arith.constant 0 : i32
    return %c0_i32, %c0_i32_0 : i32, i32
  }
  func.func @transform_6(%arg0: i32) -> (i32, i32) {
    %c0_i32 = arith.constant 0 : i32
    %c0_i32_0 = arith.constant 0 : i32
    %c0_i32_1 = arith.constant 0 : i32
    return %c0_i32, %c0_i32_0 : i32, i32
  }
  func.func @transform_7(%arg0: i32) -> (i32, i32) {
    %c0_i32 = arith.constant 0 : i32
    %c0_i32_0 = arith.constant 0 : i32
    %c0_i32_1 = arith.constant 0 : i32
    return %c0_i32, %c0_i32_0 : i32, i32
  }
  func.func @transform_8(%arg0: i32) -> (i32, i32) {
    %c0_i32 = arith.constant 0 : i32
    %c0_i32_0 = arith.constant 0 : i32
    %c0_i32_1 = arith.constant 0 : i32
    return %c0_i32, %c0_i32_0 : i32, i32
  }
  func.func @transform_9(%arg0: i32) -> (i32, i32) {
    %c0_i32 = arith.constant 0 : i32
    %c0_i32_0 = arith.constant 0 : i32
    %c0_i32_1 = arith.constant 0 : i32
    return %c0_i32, %c0_i32_0 : i32, i32
  }
  func.func @transform_10(%arg0: i32) -> (i32, i32) {
    %c0_i32 = arith.constant 0 : i32
    %c0_i32_0 = arith.constant 0 : i32
    return %arg0, %c0_i32 : i32, i32
  }
  func.func @transform_11(%arg0: i32) -> (i32, i32) {
    %c0_i32 = arith.constant 0 : i32
    %c0_i32_0 = arith.constant 0 : i32
    return %arg0, %c0_i32 : i32, i32
  }
  func.func @transform_12(%arg0: i32) -> (i32, i32, i32) {
    %c0_i32 = arith.constant 0 : i32
    %c0_i32_0 = arith.constant 0 : i32
    %c0_i32_1 = arith.constant 0 : i32
    return %arg0, %c0_i32, %c0_i32_0 : i32, i32, i32
  }
}

</mosaic_0001>

<bundles_post_ra>
// kernel: helmholtz_wake_forward.1
= control target key start
LH: loop header
LB: loop body
LE: loop exit
PB: predicated region body
PF: predicated region fallthrough
CT: control target
= control target key end

     0   :  { %s1392_s21 = smov 0   ;;  %s1565_s0 = inlined_call_operand.vmem [shape: f32[32,64], index: 0, kind: input, shape index: {}]   ;;  %s1566_s1 = inlined_call_operand.vmem [shape: f32[64,32], index: 1, kind: input, shape index: {}]   ;;  %s1567_s2 = inlined_call_operand.vmem [shape: f32[1,32], index: 2, kind: input, shape index: {}]   ;;  %s1568_s3 = inlined_call_operand.vmem [shape: f32[32,16], index: 3, kind: input, shape index: {}]   ;;  %s1569_s4 = inlined_call_operand.vmem [shape: f32[1,16], index: 4, kind: input, shape index: {}]   ;;  %s1570_s5 = inlined_call_operand.vmem [shape: f32[1,16], index: 5, kind: input, shape index: {}]   ;;  %s1571_s6 = inlined_call_operand.vmem [shape: f32[16,32], index: 6, kind: input, shape index: {}]   ;;  %s1572_s7 = inlined_call_operand.vmem [shape: f32[1,32], index: 7, kind: input, shape index: {}]   ;;  %s1573_s8 = inlined_call_operand.vmem [shape: f32[32,64], index: 8, kind: input, shape index: {}]   ;;  %s1574_s9 = inlined_call_operand.vmem [shape: f32[1,64], index: 9, kind: input, shape index: {}]   ;;  %s1575_s10 = inlined_call_operand.vmem [shape: bf16[32,32], index: 10, kind: output, shape index: {0}]   ;;  %s1576_s11 = inlined_call_operand.vmem [shape: bf16[32,16], index: 11, kind: output, shape index: {1}]   ;;  %s1577_s12 = inlined_call_operand.vmem [shape: f32[2,8,128], index: 12, kind: output, shape index: {2}]  }
   0x1 LB: > { %s1398_s22 = sadd.s32 4294967295, %s1324_s21   ;;  %p1134_p0 = scmp.ge.s32.totalorder %s1324_s21, 1  ;;  %s1324_s21 = sphi %s1392_s21, %s23_s21  }
   0x2   : > { %p368_p1 = scmp.lt.s32.totalorder %s1324_s21, 3 }
   0x4   : > { %p369_p2 = pnand %p1134_p0, %p368_p1 }
   0x5   : > { %v463_v0 = vld [vmem:[%s1566_s1] sm:$0xff] (!%p369_p2)  ;;  %v464_v1 = vld [vmem:[%s1566_s1 + $0x8] sm:$0xff] (!%p369_p2)  ;;  %v465_v2 = vld [vmem:[%s1566_s1 + $0x10] sm:$0xff] (!%p369_p2)  ;;  %s1135_s29 = sshll.u32 (!%p369_p2), %s1398_s22, 1  ;;  %vm478_vm0 = vcmask (!%p369_p2), 523264   ;;  %vm586_vm2 = vcmask (!%p369_p2), 261120   ;;  %v441_v39 = vlaneseq (!%p369_p2) }
   0x6   : > { %372 = sbr.rel (%p369_p2) target bundleno = 950 (0x3b6), region = 60  ;;  %v1249_v3 = vpack.c.bf16 (!%p369_p2), %v464_v1, %v463_v0  ;;  %v466_v4 = vld [vmem:[%s1566_s1 + $0x18] sm:$0xff] (!%p369_p2)  ;;  %p420_p3 = scmp.lt.s32.totalorder (!%p369_p2), %s1135_s29, 3  ;;  %v467_v6 = vld [vmem:[%s1566_s1 + $0x20] sm:$0xff] (!%p369_p2)  ;;  %v468_v7 = vld [vmem:[%s1566_s1 + $0x28] sm:$0xff] (!%p369_p2)  ;;  %v1326_v25 = vmov (!%p369_p2), 0.0  }
   0x7   : > { %v1253_v5 = vpack.c.bf16 (!%p369_p2), %v466_v4, %v465_v2  ;;  %v575_v8 = vld [vmem:[%s1568_s3] sm:$0xff] (!%p369_p2)  ;;  %v576_v9 = vld [vmem:[%s1568_s3 + $0x8] sm:$0xff] (!%p369_p2)  ;;  %v1257_v11 = vpack.c.bf16 (!%p369_p2), %v468_v7, %v467_v6  ;;  %v469_v12 = vld [vmem:[%s1566_s1 + $0x30] sm:$0xff] (!%p369_p2)  ;;  %vm572_vm4 = vcmask (!%p369_p2), 257024   ;;  %v1487_v41 = vshrl.u32 (!%p369_p2), %v441_v39, 7  ;;  %s1142_s20 = sshll.u32 (!%p369_p2), %s1398_s22, 4 }
   0x8   : > { %1250 = vmatprep.subr.bf16.mxu0 (!%p369_p2), %v1249_v3  ;;  %v1265_v10 = vpack.c.bf16 (!%p369_p2), %v576_v9, %v575_v8  ;;  %v470_v13 = vld [vmem:[%s1566_s1 + $0x38] sm:$0xff] (!%p369_p2)  ;;  %v577_v17 = vld [vmem:[%s1568_s3 + $0x10] sm:$0xff] (!%p369_p2)  ;;  %v1145_v20 = vld [vmem:[%s1567_s2] ss:$0 sm:$0xff] (!%p369_p2)  ;;  %v445_v43 = vstv (!%p369_p2), %s1142_s20  ;;  %vm680_vm9 = vcmask (!%p369_p2), 125952   ;;  %vm700_vm10 = vcmask (!%p369_p2), 130048  }
   0x9   : > { %1252 = vmatpush3.bf16.msra.mxu0 (!%p369_p2), %v1249_v3  ;;  %v1261_v15 = vpack.c.bf16 (!%p369_p2), %v470_v13, %v469_v12  ;;  %v578_v18 = vld [vmem:[%s1568_s3 + $0x18] sm:$0xff] (!%p369_p2)  ;;  %v720_v30 = vld [vmem:[%s1571_s6] sm:$0xff] (!%p369_p2)  ;;  %v721_v31 = vld [vmem:[%s1571_s6 + $0x8] sm:$0xff] (!%p369_p2)  ;;  %v443_v42 = vadd.s32 (!%p369_p2), 8, %v1487_v41  ;;  %v1495_v46 = vadd.s32 (!%p369_p2), %v445_v43, %v1487_v41  ;;  %vm716_vm11 = vcmask (!%p369_p2), 122880   ;;  %p437_p4 = scmp.lt.s32.totalorder (!%p369_p2), %s1398_s22, 1 }
   0xa   : > { %1254 = vmatprep.subr.bf16.mxu0 (!%p369_p2), %v1253_v5  ;;  %1266 = vmatprep.subr.bf16.mxu1 (!%p369_p2), %v1265_v10  ;;  %v1269_v19 = vpack.c.bf16 (!%p369_p2), %v578_v18, %v577_v17  ;;  %v1273_v32 = vpack.c.bf16 (!%p369_p2), %v721_v31, %v720_v30  ;;  %v854_v33 = vld [vmem:[%s1573_s8] sm:$0xff] (!%p369_p2)  ;;  %v855_v34 = vld [vmem:[%s1573_s8 + $0x8] sm:$0xff] (!%p369_p2)  ;;  %v856_v61 = vld [vmem:[%s1573_s8 + $0x10] sm:$0xff] (!%p369_p2) }
   0xb   : > { %1268 = vmatpush3.bf16.msra.mxu1 (!%p369_p2), %v1265_v10  ;;  %v1277_v35 = vpack.c.bf16 (!%p369_p2), %v855_v34, %v854_v33  ;;  %v1483_v36 = vld [vmem:[%s1570_s5] sm:$0x1] (!%p369_p2)  ;;  %v1497_v47 = vadd.s32 (!%p369_p2), %v445_v43, %v443_v42  ;;  %vm448_vm7 = vcmp.lt.s32.totalorder (!%p369_p2), %v1495_v46, 20  ;;  %v857_v62 = vld [vmem:[%s1573_s8 + $0x18] sm:$0xff] (!%p369_p2) }
   0xc   : > { %1270 = vmatprep.subr.bf16.mxu1 (!%p369_p2), %v1269_v19  ;;  %v685_v37 = vand.u32 (!%p369_p2), 2147483647, %v1483_v36  ;;  %v1150_v44 = vld [vmem:[%s1569_s4] ss:$0 sm:$0xff] (!%p369_p2)  ;;  %v1143_v57 = vsel (!%p369_p2), %vm448_vm7, 1.0, %v1326_v25  ;;  %v1281_v4 = vpack.c.bf16 (!%p369_p2), %v857_v62, %v856_v61  ;;  %v684_v13 = vmax.f32 (!%p369_p2), %v1483_v36, 0.0 }
   0xd   : > { %s1579_s29 = smov (!%p420_p3, %s1135_s29), 3  ;;  %1256 = vmatpush3.bf16.msra.mxu0 %v1253_v5  ;;  %vm449_vm8 = vcmp.lt.s32.totalorder %v1497_v47, 20  ;;  %s1581_s22 = smov (!%p437_p4, %s1398_s22), 1 }
   0xe   : > { %s1136_s24 = sshll.u32 %s1579_s29, 3  ;;  %1258 = vmatprep.subr.bf16.mxu0 %v1257_v11  ;;  %s1138_s23 = sshll.u32 %s1579_s29, 2  ;;  %v686_v38 = vsub.f32 0.0, %v685_v37  ;;  %v1144_v58 = vsel %vm449_vm8, 1.0, %v1326_v25  ;;  %v1155_v37 = vld [vmem:[%s1572_s7] ss:$0 sm:$0xff] }
   0xf   : > { %s423_s14 = scalar_lea.vmem %s1565_s0, %s1136_s24  ;;  %1272 = vmatpush3.bf16.msra.mxu1 %v1269_v19  ;;  %s1462_s26 = scalar_lea.vmem %s1575_s10, %s1138_s23  ;;  %v454_v59 = vadd.f32 %v1144_v58, %v1143_v57 }
  0x10   : > { %v1439_v14 = vld [vmem:[%s423_s14] sm:$0xff]  ;;  %v1443_v16 = vld [vmem:[%s423_s14 + $0x8] sm:$0xff]  ;;  %1274 = vmatprep.subr.bf16.mxu1 %v1273_v32  ;;  %v687_v40 = vmul.f32 1.442695, %v686_v38  ;;  %s435_s30 = scalar_lea.vmem %s1576_s11, %s1138_s23  ;;  %s1141_s19 = sshll.u32 %s1581_s22, 3 }
  0x11   : > { %1217 = vmatprep.mubr.msk.f32.mxu0 %vm478_vm0, %v1439_v14  ;;  %1260 = vmatpush3.bf16.msra.mxu0 %v1257_v11  ;;  %v455_v60 = vrot.slane %v454_v59, 4  ;;  %s440_s27 = scalar_lea.vmem %s1577_s12, %s1141_s19 }
  0x12   : > { %1262 = vmatprep.subr.bf16.mxu0 %v1261_v15  ;;  %1298 = vpow2.f32 %v687_v40 }
  0x13   : > { %v456_v1 = vadd.f32 %v455_v60, %v454_v59 }
  0x15   : > { %1264 = vmatpush3.bf16.msra.mxu0 %v1261_v15  ;;  %v457_v9 = vrot.slane %v456_v1, 2 }
  0x17   : > { %v458_v18 = vadd.f32 %v457_v9, %v456_v1 }
  0x18   : > { %1218 = vmatmul.mubr.msk.f32.vlgmr.msra.gmra.mrb[0].mxu0 %vm478_vm0, %v1443_v16 }
  0x1c   : > { %v1299_v50 = vpop.eup %1298 }
  0x1d   : > { %v689_v54 = vadd.f32 1.0, %v1299_v50 }
  0x1f   : > { %1300 = vlog2.f32 %v689_v54 }
  0x29   : > { %v1301_v5 = vpop.eup %1300 }
  0x2a   : > { %v691_v15 = vmul.f32 0.6931472, %v1301_v5 }
  0xeb   : > { %v1219_v21 = vpop.f32.mrb[0].mxu0 }
  0xec   : > { %v557_v22 = vadd.f32 %v1219_v21, %v1145_v20  ;;  %v551_v23 = vpop.f32.mrb[1].mxu0 }
  0xed   : > { %v552_v24 = vadd.f32 %v1145_v20, %v551_v23  ;;  %v692_v20 = vadd.f32 %v691_v15, %v684_v13 }
  0xee   : > { %vm561_vm1 = vcmp.gt.f32.partialorder %v557_v22, 0.0  ;;  %v459_v22 = vrot.slane %v458_v18, 1 }
  0xef   : > { %v563_v26 = vsel %vm561_vm1, 1.0, %v1326_v25  ;;  %vm560_vm3 = vcmp.gt.f32.partialorder %v552_v24, 0.0  ;;  %v693_v24 = vsub.f32 %v692_v20, %v1483_v36  ;;  %v713_v30 = vmin.f32 %v692_v20, 100.0 }
  0xf0   : > { %v562_v27 = vsel %vm560_vm3, 1.0, %v1326_v25  ;;  %v1164_v29 = vpack.c.bf16 %v563_v26, %v563_v26 }
  0xf1   : > { %v1163_v28 = vpack.c.bf16 %v562_v27, %v562_v27  ;;  %1228 = vmatprep.mubr.msk.f32.mxu1 %vm586_vm2, %v562_v27 }
  0xf2   : > { %1229 = vmatmul.mubr.msk.f32.vlgmr.msra.gmra.mrb[0].mxu1 %vm586_vm2, %v563_v26  ;;  %574 = vst.msk [vmem:[%s1462_s26 + $0x4] sm:$0xf] %vm572_vm4, %v1164_v29  ;;  %v460_v26 = vadd.f32 %v459_v22, %v458_v18  ;;  %v711_v29 = vmin.f32 %v693_v24, 100.0 }
  0xf3   : > { %573 = vst.msk [vmem:[%s1462_s26] sm:$0xf] %vm572_vm4, %v1163_v28  ;;  %1276 = vmatpush3.bf16.msra.mxu1 %v1273_v32 }
  0xf4   : > { %1278 = vmatprep.subr.bf16.mxu1 %v1277_v35 }
  0xfa   : > { %v1517_v0 = vld [vmem:[%s1462_s26] sm:$0xff]  }
  0xfb   : > { %v1173_v8 = vunpack.c.l.bf16 %v1517_v0  ;;  %v1174_v19 = vunpack.c.h.bf16 %v1517_v0 }
 0x1c5   : > { %v1230_v45 = vpop.f32.mrb[0].mxu1 }
 0x1c6   : > { %v665_v48 = vadd.f32 %v1230_v45, %v1150_v44  ;;  %v659_v49 = vpop.f32.mrb[1].mxu1 }
 0x1c7   : > { %v660_v51 = vadd.f32 %v1150_v44, %v659_v49  ;;  %v1158_v49 = vld [vmem:[%s1574_s9] ss:$0 sm:$0xff] }
 0x1c8   : > { %vm669_vm5 = vcmp.gt.f32.partialorder %v665_v48, 0.0 }
 0x1c9   : > { %v671_v52 = vsel %vm669_vm5, 1.0, %v1326_v25  ;;  %vm668_vm6 = vcmp.gt.f32.partialorder %v660_v51, 0.0 }
 0x1ca   : > { %v670_v53 = vsel %vm668_vm6, 1.0, %v1326_v25  ;;  %v1166_v56 = vpack.c.bf16 %v671_v52, %v671_v52 }
 0x1cb   : > { %v1165_v55 = vpack.c.bf16 %v670_v53, %v670_v53 }
 0x1cc   : > { %682 = vst.msk [vmem:[%s435_s30 + $0x4] sm:$0xf] %vm680_vm9, %v1166_v56 }
 0x1cd   : > { %681 = vst.msk [vmem:[%s435_s30] sm:$0xf] %vm680_vm9, %v1165_v55 }
 0x1d4   : > { %v1168_v63 = vld [vmem:[%s435_s30] sm:$0xff]  }
 0x1d5   : > { %v1169_v2 = vunpack.c.l.bf16 %v1168_v63  ;;  %v1170_v3 = vunpack.c.h.bf16 %v1168_v63 }
 0x1d7   : > { %v698_v6 = vmul.f32 %v1169_v2, %v1143_v57  ;;  %v699_v7 = vmul.f32 %v1170_v3, %v1144_v58  ;;  %1235 = vmatprep.mubr.msk.f32.mxu1 %vm700_vm10, %v1169_v2 }
 0x1d8   : > { %1236 = vmatmul.mubr.msk.f32.vlgmr.msra.gmra.mrb[2].mxu1 %vm700_vm10, %v1170_v3 }
 0x1d9   : > { %v701_v10 = vsel %vm700_vm10, %v698_v6, 0.0  ;;  %v702_v11 = vsel %vm700_vm10, %v699_v7, 0.0  ;;  %1280 = vmatpush3.bf16.msra.mxu1 %v1277_v35  ;;  %1246 = vmatprep.mubr.msk.f32.mxu1 %vm586_vm2, %v1173_v8 }
 0x1da   : > { %v703_v12 = vadd.f32 %v702_v11, %v701_v10  ;;  %1282 = vmatprep.subr.bf16.mxu1 %v1281_v4 }
 0x1dc   : > { %v704_v17 = vrot.slane %v703_v12, 4 }
 0x1dd   : > { %1284 = vmatpush3.bf16.msra.mxu1 %v1281_v4 }
 0x1de   : > { %v705_v21 = vadd.f32 %v704_v17, %v703_v12 }
 0x1e0   : > { %1247 = vmatmul.mubr.msk.f32.vlgmr.msra.gmra.mrb[4].mxu1 %vm586_vm2, %v1174_v19  ;;  %v706_v23 = vrot.slane %v705_v21, 2 }
 0x1e2   : > { %v707_v25 = vadd.f32 %v706_v23, %v705_v21 }
 0x1e4   : > { %v708_v27 = vrot.slane %v707_v25, 1 }
 0x1e6   : > { %v709_v28 = vadd.f32 %v708_v27, %v707_v25 }
 0x1e8   : > { %v710_v31 = vsub.f32 %v460_v26, %v709_v28  ;;  %v712_v32 = vmul.f32 %v711_v29, %v709_v28 }
 0x1ea   : > { %v714_v33 = vmul.f32 %v713_v30, %v710_v31 }
 0x1ec   : > { %v715_v34 = vadd.f32 %v714_v33, %v712_v32 }
 0x1ee   : > { %v717_v35 = vsel %vm716_vm11, %v715_v34, 0.0 }
 0x1ef   : > { %718 = vadd.xlane.f32.xlu1 %v717_v35 }
 0x2ab   : > { %v1237_v38 = vpop.f32.mrb[2].mxu1 }
 0x2ac   : > { %v807_v40 = vadd.f32 %v1237_v38, %v1155_v37  ;;  %v801_v36 = vpop.f32.mrb[3].mxu1  ;;  %v973_v38 = vsub.f32 1.0, %v1443_v16 }
 0x2ad   : > { %v802_v42 = vadd.f32 %v1155_v37, %v801_v36 }
 0x2ae   : > { %v813_v43 = vand.u32 2147483647, %v807_v40  ;;  %v811_v10 = vmax.f32 %v807_v40, 0.0  ;;  %v833_v15 = vmul.f32 %v1174_v19, %v807_v40 }
 0x2af   : > { %v812_v44 = vand.u32 2147483647, %v802_v42  ;;  %v810_v12 = vmax.f32 %v802_v42, 0.0  ;;  %v832_v18 = vmul.f32 %v1173_v8, %v802_v42  ;;  %v972_v42 = vsub.f32 1.0, %v1439_v14 }
 0x2b0   : > { %v815_v45 = vsub.f32 0.0, %v813_v43 }
 0x2b1   : > { %v814_v48 = vsub.f32 0.0, %v812_v44 }
 0x2b2   : > { %v818_v50 = vmul.f32 1.442695, %v815_v45 }
 0x2b3   : > { %v816_v51 = vmul.f32 1.442695, %v814_v48  ;;  %v1248_v52 = vpop.f32.mrb[4].mxu1 }
 0x2b4   : > { %1302 = vpow2.f32 %v818_v50  ;;  %v943_v53 = vadd.f32 %v1248_v52, %v1158_v49  ;;  %v937_v54 = vpop.f32.mrb[5].mxu1 }
 0x2b5   : > { %1304 = vpow2.f32 %v816_v51  ;;  %v938_v55 = vadd.f32 %v1158_v49, %v937_v54 }
 0x2b6   : > { %v949_v56 = vand.u32 2147483647, %v943_v53  ;;  %v947_v27 = vmax.f32 %v943_v53, 0.0 }
 0x2b7   : > { %v948_v57 = vand.u32 2147483647, %v938_v55  ;;  %v946_v30 = vmax.f32 %v938_v55, 0.0 }
 0x2b8   : > { %v951_v58 = vsub.f32 0.0, %v949_v56 }
 0x2b9   : > { %v950_v59 = vsub.f32 0.0, %v948_v57 }
 0x2ba   : > { %v954_v60 = vmul.f32 1.442695, %v951_v58 }
 0x2bb   : > { %v952_v61 = vmul.f32 1.442695, %v950_v59 }
 0x2bc   : > { %1306 = vpow2.f32 %v954_v60 }
 0x2bd   : > { %1308 = vpow2.f32 %v952_v61 }
 0x2be   : > { %v1303_v62 = vpop.eup %1302 }
 0x2bf   : > { %v1305_v63 = vpop.eup %1304  ;;  %v821_v1 = vadd.f32 1.0, %v1303_v62 }
 0x2c0   : > { %v820_v2 = vadd.f32 1.0, %v1305_v63 }
 0x2c1   : > { %1310 = vlog2.f32 %v821_v1 }
 0x2c2   : > { %1312 = vlog2.f32 %v820_v2 }
 0x2c6   : > { %v1307_v3 = vpop.eup %1306 }
 0x2c7   : > { %v1309_v4 = vpop.eup %1308  ;;  %v957_v5 = vadd.f32 1.0, %v1307_v3 }
 0x2c8   : > { %v956_v6 = vadd.f32 1.0, %v1309_v4 }
 0x2c9   : > { %1314 = vlog2.f32 %v957_v5  ;;  %v995_v5 = vand.u32 127, %v441_v39 }
 0x2ca   : > { %1316 = vlog2.f32 %v956_v6  ;;  %v719_v6 = vpop.xlane.xlu1 %718 }
 0x2cb   : > { %v1311_v7 = vpop.eup %1310  ;;  %vm996_vm12 = vcmp.eq.s32.totalorder %v995_v5, 0  ;;  %vm998_vm13 = vcmp.eq.s32.totalorder %v995_v5, 1  ;;  %vm1001_vm14 = vcmp.eq.s32.totalorder %v995_v5, 2 }
 0x2cc   : > { %v1313_v9 = vpop.eup %1312  ;;  %v825_v11 = vmul.f32 0.6931472, %v1311_v7 }
 0x2cd   : > { %v823_v13 = vmul.f32 0.6931472, %v1313_v9  ;;  %v1006_v9 = vsub.s32 0, %v1487_v41 }
 0x2ce   : > { %v827_v17 = vadd.f32 %v825_v11, %v811_v10  ;;  %v997_v10 = vsel %vm996_vm12, %v719_v6, 0.0 }
 0x2cf   : > { %v826_v20 = vadd.f32 %v823_v13, %v810_v12 }
 0x2d0   : > { %v835_v21 = vsub.f32 %v827_v17, %v833_v15 }
 0x2d1   : > { %v834_v22 = vsub.f32 %v826_v20, %v832_v18 }
 0x2d2   : > { %v837_v23 = vmin.f32 %v835_v21, 100.0 }
 0x2d3   : > { %v1315_v24 = vpop.eup %1314  ;;  %v836_v25 = vmin.f32 %v834_v22, 100.0 }
 0x2d4   : > { %v1317_v26 = vpop.eup %1316  ;;  %v961_v28 = vmul.f32 0.6931472, %v1315_v24  ;;  %v841_v29 = vsel %vm449_vm8, %v837_v23, 0.0 }
 0x2d5   : > { %v959_v31 = vmul.f32 0.6931472, %v1317_v26  ;;  %v840_v19 = vsel %vm448_vm7, %v836_v25, 0.0  ;;  %v843_v0 = vsel %vm586_vm2, %v841_v29, 0.0 }
 0x2d6   : > { %v963_v8 = vadd.f32 %v961_v28, %v947_v27  ;;  %v842_v32 = vsel %vm586_vm2, %v840_v19, 0.0 }
 0x2d7   : > { %v962_v33 = vadd.f32 %v959_v31, %v946_v30  ;;  %v844_v34 = vadd.f32 %v843_v0, %v842_v32 }
 0x2d8   : > { %v967_v35 = vsub.f32 %v963_v8, %v943_v53  ;;  %v975_v37 = vmin.f32 %v963_v8, 100.0 }
 0x2d9   : > { %v966_v40 = vsub.f32 %v962_v33, %v938_v55  ;;  %v974_v36 = vmin.f32 %v962_v33, 100.0  ;;  %845 = vadd.xlane.f32.xlu0 %v844_v34 }
 0x2da   : > { %v969_v43 = vmin.f32 %v967_v35, 100.0  ;;  %v977_v48 = vmul.f32 %v975_v37, %v973_v38 }
 0x2db   : > { %v968_v44 = vmin.f32 %v966_v40, 100.0  ;;  %v976_v50 = vmul.f32 %v974_v36, %v972_v42 }
 0x2dc   : > { %v971_v45 = vmul.f32 %v969_v43, %v1443_v16 }
 0x2dd   : > { %v970_v49 = vmul.f32 %v968_v44, %v1439_v14 }
 0x2de   : > { %v979_v51 = vadd.f32 %v977_v48, %v971_v45 }
 0x2df   : > { %v978_v52 = vadd.f32 %v976_v50, %v970_v49 }
 0x2e0   : > { %v981_v53 = vsel %vm449_vm8, %v979_v51, 0.0 }
 0x2e1   : > { %v980_v54 = vsel %vm448_vm7, %v978_v52, 0.0  ;;  %v983_v55 = vsel %vm478_vm0, %v981_v53, 0.0 }
 0x2e2   : > { %v982_v56 = vsel %vm478_vm0, %v980_v54, 0.0 }
 0x2e3   : > { %v984_v57 = vadd.f32 %v983_v55, %v982_v56 }
 0x2e5   : > { %985 = vadd.xlane.f32.xlu0 %v984_v57 }
 0x366   : > { %v846_v58 = vpop.xlane.xlu0 %845 }
 0x367   : > { %v847_v16 = vrot.slane %v846_v58, 4 }
 0x369   : > { %v848_v59 = vadd.f32 %v847_v16, %v846_v58 }
 0x36b   : > { %v849_v14 = vrot.slane %v848_v59, 2 }
 0x36d   : > { %v850_v60 = vadd.f32 %v849_v14, %v848_v59 }
 0x36f   : > { %v851_v61 = vrot.slane %v850_v60, 1 }
 0x371   : > { %v852_v62 = vadd.f32 %v851_v61, %v850_v60 }
 0x372   : > { %v986_v47 = vpop.xlane.xlu0 %985 }
 0x373   : > { %v987_v63 = vrot.slane %v986_v47, 4  ;;  %1285 = vpush %v852_v62 }
 0x375   : > { %v988_v46 = vadd.f32 %v987_v63, %v986_v47 }
 0x377   : > { %v989_v1 = vrot.slane %v988_v46, 2 }
 0x379   : > { %v990_v2 = vadd.f32 %v989_v1, %v988_v46 }
 0x37b   : > { %v991_v3 = vrot.slane %v990_v2, 1 }
 0x37d   : > { %v992_v4 = vadd.f32 %v991_v3, %v990_v2 }
 0x37f   : > { %1287 = vpush %v992_v4 }
 0x3a4   : > { %s1286_s18 = spop %1285 }
 0x3a5   : > { %v999_v7 = vstv %s1286_s18 }
 0x3a6   : > { %v1000_v11 = vsel %vm998_vm13, %v999_v7, %v997_v10 }
 0x3b0   : > { %s1288_s20 = spop %1287 }
 0x3b1   : > { %v1002_v12 = vstv %s1288_s20 }
 0x3b2   : > { %v1003_v13 = vsel %vm1001_vm14, %v1002_v12, %v1000_v11 }
 0x3b3   : > { %v1007_v39 = vrot.slane %v1003_v13, %v1006_v9 }
 0x3b5   : > { %1008 = vst [vmem:[%s440_s27] sm:$0xff] %v1007_v39 }
 0x3b6 PF: > { %s23_s21 = sadd.s32 1, %s1324_s21  }
 0x3b7   : > { %p20_p5 = scmp.ge.s32.totalorder %s23_s21, 4  }
 0x3b9   :  { %22 = sbr.rel (!%p20_p5) target bundleno = 1 (0x1), region = 114 }

</bundles_post_ra>
